<compile_context>
chip_gen: v7x
topology: tpu7x:2x2x1
jax: 0.10.0
libtpu: 0.0.40
codegen_flags: <defaults>
</compile_context>

<pallas_src>
import functools

import jax
import jax.numpy as jnp
from jax import lax
from jax.experimental import pallas as pl
from jax.experimental.pallas import tpu as pltpu


def bottleneck_kernel(x_ref, w1_ref, w2_ref, w3_ref, b1_ref, b2_ref, mask_ref,
                      out_ref, *, W):
    b_tile = x_ref.shape[0]
    hw = x_ref.shape[2]

    w1 = w1_ref[...]            # (C_mid, C_in)      bf16, bn1 scale folded in
    w2 = w2_ref[...]            # (9, C_mid, C_mid)  bf16, bn1 scale folded in
    w3 = w3_ref[...]            # (C_out, C_mid)     bf16, bn2 scale folded in
    b1 = b1_ref[...]            # (C_mid, 1) f32 folded BN1 bias
    b2 = b2_ref[...]            # (C_out, 1) f32 folded BN2 bias
    masks = mask_ref[...]       # (9, 1, hw) f32 border-validity masks (0/1)

    taps = [(dy, dx) for dy in (-1, 0, 1) for dx in (-1, 0, 1)]

    for b in range(b_tile):                       # static unroll over images in block
        x = x_ref[b]                              # (C_in, hw) bf16

        # ---- conv1 (1x1, scale folded) + bias + relu: one MXU matmul.
        y1 = jnp.dot(w1, x, preferred_element_type=jnp.float32)     # (C_mid, hw) f32
        y1 = jnp.maximum(y1 + b1, 0.0)

        # ---- conv2 (3x3, stride 1, pad 1): nine accumulating MXU dots on rolled
        # views. The roll wraps across row/image boundaries; those lanes are
        # zeroed by the precomputed border masks, so the result is exact.
        acc = jnp.zeros_like(y1)
        for t, (dy, dx) in enumerate(taps):
            off = dy * W + dx
            if off == 0:
                tap_in = y1                       # center tap: mask is all-ones
            else:
                tap_in = pltpu.roll(y1, shift=(-off) % hw, axis=1) * masks[t]
            acc = acc + jnp.dot(w2[t], tap_in.astype(jnp.bfloat16),
                                preferred_element_type=jnp.float32)
        # The PyTorch module reuses self.bn1 after conv2 — reproduce that exactly.
        y2 = jnp.maximum(acc + b1, 0.0).astype(jnp.bfloat16)        # (C_mid, hw)

        # ---- conv3 (1x1, scale folded) + bias, identity residual (f32) + relu.
        y3 = jnp.dot(w3, y2, preferred_element_type=jnp.float32) + b2
        out_ref[b] = jnp.maximum(y3 + x.astype(jnp.float32), 0.0).astype(out_ref.dtype)


def bottleneck_block(x_nchw, w1_oihw, w2_oihw, w3_oihw,
                     bn1_scale, bn1_bias, bn2_scale, bn2_bias, b_tile=None):
    """Forward of BasicBlock_50_101_152 with downsample=None (stride=1).

    x_nchw:   (N, C_in, H, W) float32
    w1_oihw:  (C_mid, C_in, 1, 1)   conv1 weight (PyTorch OIHW layout)
    w2_oihw:  (C_mid, C_mid, 3, 3)  conv2 weight
    w3_oihw:  (C_out, C_mid, 1, 1)  conv3 weight
    bn*_scale/bias: folded eval-mode BatchNorm scale/bias, shape (C,)
    Returns (N, C_out, H, W) in bfloat16 (bf16 HBM output slab — halved writeback).
    """
    N, C_in, H, W = x_nchw.shape
    C_mid = w1_oihw.shape[0]
    C_out = w3_oihw.shape[0]
    assert C_in == C_out, "identity residual requires input_channel == output_channel"
    HW = H * W

    # b_tile: target a few MiB of I/O per grid step while keeping >= 2 grid steps
    # (v7x: 2 TensorCores; also enables DMA/compute overlap). Unroll capped at 8.
    if b_tile is None:
        per_image_bytes = (C_in + C_out) * HW * 2          # bf16 in + out slabs
        cap = max(1, (4 << 20) // max(per_image_bytes, 1))
        if N >= 2:
            cap = min(cap, N // 2)
        cap = max(1, min(cap, N, 8))
        b_tile = 1
        for d in range(1, cap + 1):
            if N % d == 0:
                b_tile = d
    assert N % b_tile == 0

    # Transpose-free, lane-dense slab: (N, C, H*W) is a FREE reshape of NCHW.
    # One-time bf16 cast (in a full network activations already live in bf16).
    x_slab = x_nchw.reshape(N, C_in, HW).astype(jnp.bfloat16)

    # Fold eval-mode BN scales into the conv weights; cast once to bf16 (MXU operands).
    s1 = bn1_scale.astype(jnp.float32)
    s2 = bn2_scale.astype(jnp.float32)
    w1 = (w1_oihw[:, :, 0, 0] * s1[:, None]).astype(jnp.bfloat16)          # (C_mid, C_in)
    w2s = w2_oihw * s1[:, None, None, None]                                # bn1 reused after conv2
    w2 = jnp.transpose(w2s, (2, 3, 0, 1)).reshape(9, C_mid, C_mid).astype(jnp.bfloat16)
    w3 = (w3_oihw[:, :, 0, 0] * s2[:, None]).astype(jnp.bfloat16)          # (C_out, C_mid)
    b1 = bn1_bias.reshape(C_mid, 1).astype(jnp.float32)
    b2 = bn2_bias.reshape(C_out, 1).astype(jnp.float32)

    # 3x3 border-validity masks: depend only on (H, W); computed once here
    # (not per grid step). Tap order matches the kernel's (dy, dx) loop.
    pos = jnp.arange(HW, dtype=jnp.int32)
    hh, ww = pos // W, pos % W
    masks = jnp.stack([(hh + dy >= 0) & (hh + dy < H) & (ww + dx >= 0) & (ww + dx < W)
                       for dy in (-1, 0, 1) for dx in (-1, 0, 1)])
    masks = masks.astype(jnp.float32).reshape(9, 1, HW)

    kernel = functools.partial(bottleneck_kernel, W=W)

    out_slab = pl.pallas_call(
        kernel,
        out_shape=jax.ShapeDtypeStruct((N, C_out, HW), jnp.bfloat16),
        grid=(N // b_tile,),
        in_specs=[
            pl.BlockSpec((b_tile, C_in, HW), lambda n: (n, 0, 0)),
            pl.BlockSpec((C_mid, C_in), lambda n: (0, 0)),
            pl.BlockSpec((9, C_mid, C_mid), lambda n: (0, 0, 0)),
            pl.BlockSpec((C_out, C_mid), lambda n: (0, 0)),
            pl.BlockSpec((C_mid, 1), lambda n: (0, 0)),
            pl.BlockSpec((C_out, 1), lambda n: (0, 0)),
            pl.BlockSpec((9, 1, HW), lambda n: (0, 0, 0)),
        ],
        out_specs=pl.BlockSpec((b_tile, C_out, HW), lambda n: (n, 0, 0)),
        compiler_params=pltpu.CompilerParams(
            dimension_semantics=("parallel",),
            # 48 MiB: under v7x's 64 MiB physical VMEM, above the 32 MiB scoped
            # default on v5e/v6e (their 128 MiB leaves further headroom).
            vmem_limit_bytes=48 * 1024 * 1024),
    )(x_slab, w1, w2, w3, b1, b2, masks)

    return out_slab.reshape(N, C_out, H, W)        # free reshape, bf16 output


def reference_block(x, w1, w2, w3, s1, b1, s2, b2):
    """Pure-JAX f32 reference (lax.conv, NCHW/OIHW — matches PyTorch layouts)."""
    dn = ("NCHW", "OIHW", "NCHW")

    def bn(y, s, b):
        return y * s.reshape(1, -1, 1, 1) + b.reshape(1, -1, 1, 1)

    y = lax.conv_general_dilated(x, w1, (1, 1), "VALID", dimension_numbers=dn)
    y = jnp.maximum(bn(y, s1, b1), 0.0)
    y = lax.conv_general_dilated(y, w2, (1, 1), [(1, 1), (1, 1)], dimension_numbers=dn)
    y = jnp.maximum(bn(y, s1, b1), 0.0)   # module reuses bn1 after conv2
    y = lax.conv_general_dilated(y, w3, (1, 1), "VALID", dimension_numbers=dn)
    y = bn(y, s2, b2)
    return jnp.maximum(y + x, 0.0)


if __name__ == "__main__":
    # Shapes consistent with the module: expansion=4, output_channel=16 ->
    # temp_channel=4; input_channel=16 (required by identity residual); stride=1.
    N, C_in, H, W = 2, 16, 16, 16
    C_out, C_mid = 16, 4
    eps = 1e-5

    key = jax.random.PRNGKey(0)
    k = jax.random.split(key, 12)

    x = jax.random.normal(k[0], (N, C_in, H, W), jnp.float32)

    w1 = 0.1 * jax.random.normal(k[1], (C_mid, C_in, 1, 1), jnp.float32)
    w2 = 0.1 * jax.random.normal(k[2], (C_mid, C_mid, 3, 3), jnp.float32)
    w3 = 0.1 * jax.random.normal(k[3], (C_out, C_mid, 1, 1), jnp.float32)

    # Eval-mode BatchNorm parameters, folded to per-channel scale/bias.
    g1 = 1.0 + 0.1 * jax.random.normal(k[4], (C_mid,), jnp.float32)
    be1 = 0.05 * jax.random.normal(k[5], (C_mid,), jnp.float32)
    rm1 = 0.1 * jax.random.normal(k[6], (C_mid,), jnp.float32)
    rv1 = 1.0 + 0.1 * jax.random.uniform(k[7], (C_mid,), jnp.float32)
    g2 = 1.0 + 0.1 * jax.random.normal(k[8], (C_out,), jnp.float32)
    be2 = 0.05 * jax.random.normal(k[9], (C_out,), jnp.float32)
    rm2 = 0.1 * jax.random.normal(k[10], (C_out,), jnp.float32)
    rv2 = 1.0 + 0.1 * jax.random.uniform(k[11], (C_out,), jnp.float32)

    s1 = g1 / jnp.sqrt(rv1 + eps)
    b1 = be1 - rm1 * s1
    s2 = g2 / jnp.sqrt(rv2 + eps)
    b2 = be2 - rm2 * s2

    out = jax.block_until_ready(bottleneck_block(x, w1, w2, w3, s1, b1, s2, b2))
    ref = jax.block_until_ready(reference_block(x, w1, w2, w3, s1, b1, s2, b2))

    assert out.shape == (N, C_out, H, W), out.shape
    out_f32 = out.astype(jnp.float32)
    # bf16 I/O slabs + bf16 MXU operands with f32 accumulation -> loose tolerance.
    max_err = float(jnp.max(jnp.abs(out_f32 - ref)))
    assert jnp.allclose(out_f32, ref, rtol=5e-2, atol=5e-2), max_err
    print("KERNEL_OK")
</pallas_src>

<mosaic_0001>
module attributes {stable_mosaic.version = 11 : i64} {
  func.func @bottleneck_kernel(%arg0: i32, %arg1: memref<1x16x256xbf16, #tpu.memory_space<vmem>>, %arg2: memref<4x16xbf16, #tpu.memory_space<vmem>>, %arg3: memref<9x4x4xbf16, #tpu.memory_space<vmem>>, %arg4: memref<16x4xbf16, #tpu.memory_space<vmem>>, %arg5: memref<4x1xf32, #tpu.memory_space<vmem>>, %arg6: memref<16x1xf32, #tpu.memory_space<vmem>>, %arg7: memref<9x1x256xf32, #tpu.memory_space<vmem>>, %arg8: memref<1x16x256xbf16, #tpu.memory_space<vmem>>) attributes {dimension_semantics = [#tpu.dimension_semantics<parallel>], iteration_bounds = array<i64: 2>, scalar_prefetch = 0 : i64, scratch_operands = 0 : i64, tpu.core_type = #tpu.core_type<tc>, window_params = [{transform_indices = @transform_0, window_bounds = array<i64: 1, 16, 256>}, {pipeline_mode = #tpu.pipeline_mode<synchronous>, transform_indices = @transform_1, window_bounds = array<i64: 4, 16>}, {pipeline_mode = #tpu.pipeline_mode<synchronous>, transform_indices = @transform_2, window_bounds = array<i64: 9, 4, 4>}, {pipeline_mode = #tpu.pipeline_mode<synchronous>, transform_indices = @transform_3, window_bounds = array<i64: 16, 4>}, {pipeline_mode = #tpu.pipeline_mode<synchronous>, transform_indices = @transform_4, window_bounds = array<i64: 4, 1>}, {pipeline_mode = #tpu.pipeline_mode<synchronous>, transform_indices = @transform_5, window_bounds = array<i64: 16, 1>}, {pipeline_mode = #tpu.pipeline_mode<synchronous>, transform_indices = @transform_6, window_bounds = array<i64: 9, 1, 256>}, {transform_indices = @transform_7, window_bounds = array<i64: 1, 16, 256>}]} {
    %c0 = arith.constant 0 : index
    %c0_0 = arith.constant 0 : index
    %0 = vector.load %arg2[%c0, %c0_0] : memref<4x16xbf16, #tpu.memory_space<vmem>>, vector<4x16xbf16>
    %c0_1 = arith.constant 0 : index
    %c0_2 = arith.constant 0 : index
    %c0_3 = arith.constant 0 : index
    %1 = vector.load %arg3[%c0_1, %c0_2, %c0_3] : memref<9x4x4xbf16, #tpu.memory_space<vmem>>, vector<9x4x4xbf16>
    %c0_4 = arith.constant 0 : index
    %c0_5 = arith.constant 0 : index
    %2 = vector.load %arg4[%c0_4, %c0_5] : memref<16x4xbf16, #tpu.memory_space<vmem>>, vector<16x4xbf16>
    %c0_6 = arith.constant 0 : index
    %c0_7 = arith.constant 0 : index
    %3 = vector.load %arg5[%c0_6, %c0_7] : memref<4x1xf32, #tpu.memory_space<vmem>>, vector<4x1xf32>
    %c0_8 = arith.constant 0 : index
    %c0_9 = arith.constant 0 : index
    %4 = vector.load %arg6[%c0_8, %c0_9] : memref<16x1xf32, #tpu.memory_space<vmem>>, vector<16x1xf32>
    %c0_10 = arith.constant 0 : index
    %c0_11 = arith.constant 0 : index
    %c0_12 = arith.constant 0 : index
    %5 = vector.load %arg7[%c0_10, %c0_11, %c0_12] : memref<9x1x256xf32, #tpu.memory_space<vmem>>, vector<9x1x256xf32>
    %c0_13 = arith.constant 0 : index
    %c0_14 = arith.constant 0 : index
    %c0_15 = arith.constant 0 : index
    %6 = vector.load %arg1[%c0_13, %c0_14, %c0_15] : memref<1x16x256xbf16, #tpu.memory_space<vmem>>, vector<1x16x256xbf16>
    %7 = vector.shape_cast %6 : vector<1x16x256xbf16> to vector<16x256xbf16>
    %cst = arith.constant dense<0.000000e+00> : vector<4x256xf32>
    %8 = tpu.matmul %0, %7, %cst {dimension_numbers = #tpu.dot_dimension_numbers<[1], [0], [0], [1], [0, 0, 1, 1], [], []>} : vector<4x16xbf16>, vector<16x256xbf16>, vector<4x256xf32> -> vector<4x256xf32>
    %9 = vector.broadcast %3 : vector<4x1xf32> to vector<4x256xf32>
    %10 = arith.addf %8, %9 : vector<4x256xf32>
    %cst_16 = arith.constant 0.000000e+00 : f32
    %11 = vector.broadcast %cst_16 : f32 to vector<4x256xf32>
    %12 = arith.maximumf %10, %11 : vector<4x256xf32>
    %cst_17 = arith.constant 0.000000e+00 : f32
    %13 = vector.broadcast %cst_17 : f32 to vector<4x256xf32>
    %c17_i32 = arith.constant 17 : i32
    %14 = tpu.dynamic_rotate %12 by %c17_i32 dim 1 : vector<4x256xf32>, i32 -> vector<4x256xf32>
    %15 = vector.extract_strided_slice %5 {offsets = [0, 0, 0], sizes = [1, 1, 256], strides = [1, 1, 1]} : vector<9x1x256xf32> to vector<1x1x256xf32>
    %16 = vector.shape_cast %15 : vector<1x1x256xf32> to vector<1x256xf32>
    %17 = vector.broadcast %16 : vector<1x256xf32> to vector<4x256xf32>
    %18 = arith.mulf %14, %17 : vector<4x256xf32>
    %19 = vector.extract_strided_slice %1 {offsets = [0, 0, 0], sizes = [1, 4, 4], strides = [1, 1, 1]} : vector<9x4x4xbf16> to vector<1x4x4xbf16>
    %20 = vector.shape_cast %19 : vector<1x4x4xbf16> to vector<4x4xbf16>
    %21 = arith.truncf %18 : vector<4x256xf32> to vector<4x256xbf16>
    %cst_18 = arith.constant dense<0.000000e+00> : vector<4x256xf32>
    %22 = tpu.matmul %20, %21, %cst_18 {dimension_numbers = #tpu.dot_dimension_numbers<[1], [0], [0], [1], [0, 0, 1, 1], [], []>} : vector<4x4xbf16>, vector<4x256xbf16>, vector<4x256xf32> -> vector<4x256xf32>
    %23 = arith.addf %13, %22 : vector<4x256xf32>
    %c16_i32 = arith.constant 16 : i32
    %24 = tpu.dynamic_rotate %12 by %c16_i32 dim 1 : vector<4x256xf32>, i32 -> vector<4x256xf32>
    %25 = vector.extract_strided_slice %5 {offsets = [1, 0, 0], sizes = [1, 1, 256], strides = [1, 1, 1]} : vector<9x1x256xf32> to vector<1x1x256xf32>
    %26 = vector.shape_cast %25 : vector<1x1x256xf32> to vector<1x256xf32>
    %27 = vector.broadcast %26 : vector<1x256xf32> to vector<4x256xf32>
    %28 = arith.mulf %24, %27 : vector<4x256xf32>
    %29 = vector.extract_strided_slice %1 {offsets = [1, 0, 0], sizes = [1, 4, 4], strides = [1, 1, 1]} : vector<9x4x4xbf16> to vector<1x4x4xbf16>
    %30 = vector.shape_cast %29 : vector<1x4x4xbf16> to vector<4x4xbf16>
    %31 = arith.truncf %28 : vector<4x256xf32> to vector<4x256xbf16>
    %cst_19 = arith.constant dense<0.000000e+00> : vector<4x256xf32>
    %32 = tpu.matmul %30, %31, %cst_19 {dimension_numbers = #tpu.dot_dimension_numbers<[1], [0], [0], [1], [0, 0, 1, 1], [], []>} : vector<4x4xbf16>, vector<4x256xbf16>, vector<4x256xf32> -> vector<4x256xf32>
    %33 = arith.addf %23, %32 : vector<4x256xf32>
    %c15_i32 = arith.constant 15 : i32
    %34 = tpu.dynamic_rotate %12 by %c15_i32 dim 1 : vector<4x256xf32>, i32 -> vector<4x256xf32>
    %35 = vector.extract_strided_slice %5 {offsets = [2, 0, 0], sizes = [1, 1, 256], strides = [1, 1, 1]} : vector<9x1x256xf32> to vector<1x1x256xf32>
    %36 = vector.shape_cast %35 : vector<1x1x256xf32> to vector<1x256xf32>
    %37 = vector.broadcast %36 : vector<1x256xf32> to vector<4x256xf32>
    %38 = arith.mulf %34, %37 : vector<4x256xf32>
    %39 = vector.extract_strided_slice %1 {offsets = [2, 0, 0], sizes = [1, 4, 4], strides = [1, 1, 1]} : vector<9x4x4xbf16> to vector<1x4x4xbf16>
    %40 = vector.shape_cast %39 : vector<1x4x4xbf16> to vector<4x4xbf16>
    %41 = arith.truncf %38 : vector<4x256xf32> to vector<4x256xbf16>
    %cst_20 = arith.constant dense<0.000000e+00> : vector<4x256xf32>
    %42 = tpu.matmul %40, %41, %cst_20 {dimension_numbers = #tpu.dot_dimension_numbers<[1], [0], [0], [1], [0, 0, 1, 1], [], []>} : vector<4x4xbf16>, vector<4x256xbf16>, vector<4x256xf32> -> vector<4x256xf32>
    %43 = arith.addf %33, %42 : vector<4x256xf32>
    %c1_i32 = arith.constant 1 : i32
    %44 = tpu.dynamic_rotate %12 by %c1_i32 dim 1 : vector<4x256xf32>, i32 -> vector<4x256xf32>
    %45 = vector.extract_strided_slice %5 {offsets = [3, 0, 0], sizes = [1, 1, 256], strides = [1, 1, 1]} : vector<9x1x256xf32> to vector<1x1x256xf32>
    %46 = vector.shape_cast %45 : vector<1x1x256xf32> to vector<1x256xf32>
    %47 = vector.broadcast %46 : vector<1x256xf32> to vector<4x256xf32>
    %48 = arith.mulf %44, %47 : vector<4x256xf32>
    %49 = vector.extract_strided_slice %1 {offsets = [3, 0, 0], sizes = [1, 4, 4], strides = [1, 1, 1]} : vector<9x4x4xbf16> to vector<1x4x4xbf16>
    %50 = vector.shape_cast %49 : vector<1x4x4xbf16> to vector<4x4xbf16>
    %51 = arith.truncf %48 : vector<4x256xf32> to vector<4x256xbf16>
    %cst_21 = arith.constant dense<0.000000e+00> : vector<4x256xf32>
    %52 = tpu.matmul %50, %51, %cst_21 {dimension_numbers = #tpu.dot_dimension_numbers<[1], [0], [0], [1], [0, 0, 1, 1], [], []>} : vector<4x4xbf16>, vector<4x256xbf16>, vector<4x256xf32> -> vector<4x256xf32>
    %53 = arith.addf %43, %52 : vector<4x256xf32>
    %54 = vector.extract_strided_slice %1 {offsets = [4, 0, 0], sizes = [1, 4, 4], strides = [1, 1, 1]} : vector<9x4x4xbf16> to vector<1x4x4xbf16>
    %55 = vector.shape_cast %54 : vector<1x4x4xbf16> to vector<4x4xbf16>
    %56 = arith.truncf %12 : vector<4x256xf32> to vector<4x256xbf16>
    %cst_22 = arith.constant dense<0.000000e+00> : vector<4x256xf32>
    %57 = tpu.matmul %55, %56, %cst_22 {dimension_numbers = #tpu.dot_dimension_numbers<[1], [0], [0], [1], [0, 0, 1, 1], [], []>} : vector<4x4xbf16>, vector<4x256xbf16>, vector<4x256xf32> -> vector<4x256xf32>
    %58 = arith.addf %53, %57 : vector<4x256xf32>
    %c255_i32 = arith.constant 255 : i32
    %59 = tpu.dynamic_rotate %12 by %c255_i32 dim 1 : vector<4x256xf32>, i32 -> vector<4x256xf32>
    %60 = vector.extract_strided_slice %5 {offsets = [5, 0, 0], sizes = [1, 1, 256], strides = [1, 1, 1]} : vector<9x1x256xf32> to vector<1x1x256xf32>
    %61 = vector.shape_cast %60 : vector<1x1x256xf32> to vector<1x256xf32>
    %62 = vector.broadcast %61 : vector<1x256xf32> to vector<4x256xf32>
    %63 = arith.mulf %59, %62 : vector<4x256xf32>
    %64 = vector.extract_strided_slice %1 {offsets = [5, 0, 0], sizes = [1, 4, 4], strides = [1, 1, 1]} : vector<9x4x4xbf16> to vector<1x4x4xbf16>
    %65 = vector.shape_cast %64 : vector<1x4x4xbf16> to vector<4x4xbf16>
    %66 = arith.truncf %63 : vector<4x256xf32> to vector<4x256xbf16>
    %cst_23 = arith.constant dense<0.000000e+00> : vector<4x256xf32>
    %67 = tpu.matmul %65, %66, %cst_23 {dimension_numbers = #tpu.dot_dimension_numbers<[1], [0], [0], [1], [0, 0, 1, 1], [], []>} : vector<4x4xbf16>, vector<4x256xbf16>, vector<4x256xf32> -> vector<4x256xf32>
    %68 = arith.addf %58, %67 : vector<4x256xf32>
    %c241_i32 = arith.constant 241 : i32
    %69 = tpu.dynamic_rotate %12 by %c241_i32 dim 1 : vector<4x256xf32>, i32 -> vector<4x256xf32>
    %70 = vector.extract_strided_slice %5 {offsets = [6, 0, 0], sizes = [1, 1, 256], strides = [1, 1, 1]} : vector<9x1x256xf32> to vector<1x1x256xf32>
    %71 = vector.shape_cast %70 : vector<1x1x256xf32> to vector<1x256xf32>
    %72 = vector.broadcast %71 : vector<1x256xf32> to vector<4x256xf32>
    %73 = arith.mulf %69, %72 : vector<4x256xf32>
    %74 = vector.extract_strided_slice %1 {offsets = [6, 0, 0], sizes = [1, 4, 4], strides = [1, 1, 1]} : vector<9x4x4xbf16> to vector<1x4x4xbf16>
    %75 = vector.shape_cast %74 : vector<1x4x4xbf16> to vector<4x4xbf16>
    %76 = arith.truncf %73 : vector<4x256xf32> to vector<4x256xbf16>
    %cst_24 = arith.constant dense<0.000000e+00> : vector<4x256xf32>
    %77 = tpu.matmul %75, %76, %cst_24 {dimension_numbers = #tpu.dot_dimension_numbers<[1], [0], [0], [1], [0, 0, 1, 1], [], []>} : vector<4x4xbf16>, vector<4x256xbf16>, vector<4x256xf32> -> vector<4x256xf32>
    %78 = arith.addf %68, %77 : vector<4x256xf32>
    %c240_i32 = arith.constant 240 : i32
    %79 = tpu.dynamic_rotate %12 by %c240_i32 dim 1 : vector<4x256xf32>, i32 -> vector<4x256xf32>
    %80 = vector.extract_strided_slice %5 {offsets = [7, 0, 0], sizes = [1, 1, 256], strides = [1, 1, 1]} : vector<9x1x256xf32> to vector<1x1x256xf32>
    %81 = vector.shape_cast %80 : vector<1x1x256xf32> to vector<1x256xf32>
    %82 = vector.broadcast %81 : vector<1x256xf32> to vector<4x256xf32>
    %83 = arith.mulf %79, %82 : vector<4x256xf32>
    %84 = vector.extract_strided_slice %1 {offsets = [7, 0, 0], sizes = [1, 4, 4], strides = [1, 1, 1]} : vector<9x4x4xbf16> to vector<1x4x4xbf16>
    %85 = vector.shape_cast %84 : vector<1x4x4xbf16> to vector<4x4xbf16>
    %86 = arith.truncf %83 : vector<4x256xf32> to vector<4x256xbf16>
    %cst_25 = arith.constant dense<0.000000e+00> : vector<4x256xf32>
    %87 = tpu.matmul %85, %86, %cst_25 {dimension_numbers = #tpu.dot_dimension_numbers<[1], [0], [0], [1], [0, 0, 1, 1], [], []>} : vector<4x4xbf16>, vector<4x256xbf16>, vector<4x256xf32> -> vector<4x256xf32>
    %88 = arith.addf %78, %87 : vector<4x256xf32>
    %c239_i32 = arith.constant 239 : i32
    %89 = tpu.dynamic_rotate %12 by %c239_i32 dim 1 : vector<4x256xf32>, i32 -> vector<4x256xf32>
    %90 = vector.extract_strided_slice %5 {offsets = [8, 0, 0], sizes = [1, 1, 256], strides = [1, 1, 1]} : vector<9x1x256xf32> to vector<1x1x256xf32>
    %91 = vector.shape_cast %90 : vector<1x1x256xf32> to vector<1x256xf32>
    %92 = vector.broadcast %91 : vector<1x256xf32> to vector<4x256xf32>
    %93 = arith.mulf %89, %92 : vector<4x256xf32>
    %94 = vector.extract_strided_slice %1 {offsets = [8, 0, 0], sizes = [1, 4, 4], strides = [1, 1, 1]} : vector<9x4x4xbf16> to vector<1x4x4xbf16>
    %95 = vector.shape_cast %94 : vector<1x4x4xbf16> to vector<4x4xbf16>
    %96 = arith.truncf %93 : vector<4x256xf32> to vector<4x256xbf16>
    %cst_26 = arith.constant dense<0.000000e+00> : vector<4x256xf32>
    %97 = tpu.matmul %95, %96, %cst_26 {dimension_numbers = #tpu.dot_dimension_numbers<[1], [0], [0], [1], [0, 0, 1, 1], [], []>} : vector<4x4xbf16>, vector<4x256xbf16>, vector<4x256xf32> -> vector<4x256xf32>
    %98 = arith.addf %88, %97 : vector<4x256xf32>
    %99 = vector.broadcast %3 : vector<4x1xf32> to vector<4x256xf32>
    %100 = arith.addf %98, %99 : vector<4x256xf32>
    %cst_27 = arith.constant 0.000000e+00 : f32
    %101 = vector.broadcast %cst_27 : f32 to vector<4x256xf32>
    %102 = arith.maximumf %100, %101 : vector<4x256xf32>
    %103 = arith.truncf %102 : vector<4x256xf32> to vector<4x256xbf16>
    %cst_28 = arith.constant dense<0.000000e+00> : vector<16x256xf32>
    %104 = tpu.matmul %2, %103, %cst_28 {dimension_numbers = #tpu.dot_dimension_numbers<[1], [0], [0], [1], [0, 0, 1, 1], [], []>} : vector<16x4xbf16>, vector<4x256xbf16>, vector<16x256xf32> -> vector<16x256xf32>
    %105 = vector.broadcast %4 : vector<16x1xf32> to vector<16x256xf32>
    %106 = arith.addf %104, %105 : vector<16x256xf32>
    %107 = arith.extf %7 : vector<16x256xbf16> to vector<16x256xf32>
    %108 = arith.addf %106, %107 : vector<16x256xf32>
    %cst_29 = arith.constant 0.000000e+00 : f32
    %109 = vector.broadcast %cst_29 : f32 to vector<16x256xf32>
    %110 = arith.maximumf %108, %109 : vector<16x256xf32>
    %111 = arith.truncf %110 : vector<16x256xf32> to vector<16x256xbf16>
    %c0_30 = arith.constant 0 : index
    %c0_31 = arith.constant 0 : index
    %c0_32 = arith.constant 0 : index
    %112 = vector.load %arg8[%c0_30, %c0_31, %c0_32] : memref<1x16x256xbf16, #tpu.memory_space<vmem>>, vector<1x16x256xbf16>
    %113 = vector.shape_cast %112 : vector<1x16x256xbf16> to vector<16x256xbf16>
    %114 = vector.shape_cast %111 : vector<16x256xbf16> to vector<1x16x256xbf16>
    tpu.vector_store %arg8[%c0_30, %c0_31, %c0_32], %114 {strides = array<i32>} : memref<1x16x256xbf16, #tpu.memory_space<vmem>>, vector<1x16x256xbf16>,
    return
  }
  func.func @transform_0(%arg0: i32) -> (i32, i32, i32) {
    %c0_i32 = arith.constant 0 : i32
    %c0_i32_0 = arith.constant 0 : i32
    %c0_i32_1 = arith.constant 0 : i32
    return %arg0, %c0_i32, %c0_i32_0 : i32, i32, i32
  }
  func.func @transform_1(%arg0: i32) -> (i32, i32) {
    %c0_i32 = arith.constant 0 : i32
    %c0_i32_0 = arith.constant 0 : i32
    %c0_i32_1 = arith.constant 0 : i32
    return %c0_i32, %c0_i32_0 : i32, i32
  }
  func.func @transform_2(%arg0: i32) -> (i32, i32, i32) {
    %c0_i32 = arith.constant 0 : i32
    %c0_i32_0 = arith.constant 0 : i32
    %c0_i32_1 = arith.constant 0 : i32
    %c0_i32_2 = arith.constant 0 : i32
    return %c0_i32, %c0_i32_0, %c0_i32_1 : i32, i32, i32
  }
  func.func @transform_3(%arg0: i32) -> (i32, i32) {
    %c0_i32 = arith.constant 0 : i32
    %c0_i32_0 = arith.constant 0 : i32
    %c0_i32_1 = arith.constant 0 : i32
    return %c0_i32, %c0_i32_0 : i32, i32
  }
  func.func @transform_4(%arg0: i32) -> (i32, i32) {
    %c0_i32 = arith.constant 0 : i32
    %c0_i32_0 = arith.constant 0 : i32
    %c0_i32_1 = arith.constant 0 : i32
    return %c0_i32, %c0_i32_0 : i32, i32
  }
  func.func @transform_5(%arg0: i32) -> (i32, i32) {
    %c0_i32 = arith.constant 0 : i32
    %c0_i32_0 = arith.constant 0 : i32
    %c0_i32_1 = arith.constant 0 : i32
    return %c0_i32, %c0_i32_0 : i32, i32
  }
  func.func @transform_6(%arg0: i32) -> (i32, i32, i32) {
    %c0_i32 = arith.constant 0 : i32
    %c0_i32_0 = arith.constant 0 : i32
    %c0_i32_1 = arith.constant 0 : i32
    %c0_i32_2 = arith.constant 0 : i32
    return %c0_i32, %c0_i32_0, %c0_i32_1 : i32, i32, i32
  }
  func.func @transform_7(%arg0: i32) -> (i32, i32, i32) {
    %c0_i32 = arith.constant 0 : i32
    %c0_i32_0 = arith.constant 0 : i32
    %c0_i32_1 = arith.constant 0 : i32
    return %arg0, %c0_i32, %c0_i32_0 : i32, i32, i32
  }
}

</mosaic_0001>

<bundles_post_ra>
// kernel: tpu_custom_call.1
= control target key start
LH: loop header
LB: loop body
LE: loop exit
PB: predicated region body
PF: predicated region fallthrough
CT: control target
= control target key end

     0   :  { %12 = vsyncpa [#allocation3], 0  ;;  %s1711_s0 = inlined_call_operand.vmem [shape: bf16[2,16,256], index: 0, kind: input, shape index: {}]   ;;  %s1712_s1 = inlined_call_operand.vmem [shape: bf16[4,16], index: 1, kind: input, shape index: {}]   ;;  %s1713_s2 = inlined_call_operand.vmem [shape: bf16[9,4,4], index: 2, kind: input, shape index: {}]   ;;  %s1714_s3 = inlined_call_operand.vmem [shape: bf16[16,4], index: 3, kind: input, shape index: {}]   ;;  %s1715_s4 = inlined_call_operand.vmem [shape: f32[4,1], index: 4, kind: input, shape index: {}]   ;;  %s1716_s5 = inlined_call_operand.vmem [shape: f32[16,1], index: 5, kind: input, shape index: {}]   ;;  %s1717_s6 = inlined_call_operand.vmem [shape: f32[9,1,256], index: 6, kind: input, shape index: {}]   ;;  %s1718_s7 = inlined_call_operand.hbm [shape: bf16[2,16,256], index: 7, kind: output, shape index: {}]  }
   0x1   :  { %14 = vsyncpa [#allocation3 + $0x1], 0  ;;  %s1399_s24 = smov 0   ;;  %s1401_s25 = smov 0  }
   0x2   :  { %s1403_s26 = smov 0   ;;  %s1405_s27 = smov 0  }
   0x3 LB: > { %s1420_s28 = sadd.s32 4294967295, %s1345_s27   ;;  %s1186_s29 = sadd.s32 4294967294, %s1345_s27   ;;  %s1345_s27 = sphi %s1405_s27, %s1724_s27   ;;  %s1341_s26 = sphi %s1403_s26, %s1723_s26   ;;  %s1337_s25 = sphi %s1401_s25, %s1722_s25   ;;  %s1333_s24 = sphi %s1399_s24, %s1721_s24  }
   0x4   : > { %s1424_s30 = sadd.s32 1, %s1345_s27   ;;  %s179_s8 = sadd.s32 1, %s1341_s26 }
   0x5   : > { %s176_s9 = ssub.s32 %s1345_s27, %s1424_s30  ;;  %p189_p0 = scmp.ne.s32.totalorder %s1341_s26, %s1337_s25 }
   0x6   : > { %p177_p1 = scmp.eq.s32.totalorder %s176_s9, 0  ;;  %p190_p2 = scmp.eq.s32.totalorder %s1420_s28, 1 }
   0x7   : > { %p195_p3 = scmp.ne.s32.totalorder %s1337_s25, %s1333_s24  ;;  %p196_p4 = scmp.eq.s32.totalorder %s1186_s29, 1 }
   0x8   : > { %s1435_s10 = scalar_select %p177_p1, %s1341_s26, %s179_s8  }
   0x9   : > { %p1437_p5 = por %p190_p2, %p189_p0  ;;  %p1441_p6 = por %p196_p4, %p195_p3 }
   0xa   : > { %p1189_p7 = scmp.ge.s32.totalorder %s1345_s27, 1  ;;  %p240_p8 = scmp.lt.s32.totalorder %s1345_s27, 3 }
   0xc   : > { %p241_p9 = pnand %p1189_p7, %p240_p8 }
   0xd   : > { %p272_p10 = scmp.lt.s32.totalorder (!%p241_p9), %s1420_s28, 1  ;;  %v1347_v0 = vmov (!%p241_p9), 0   ;;  %v290_v1 = vld [vmem:[%s1715_s4] sm:$0xf] (!%p241_p9)  ;;  %vm318_vm0 = vcmask (!%p241_p9), 130048   ;;  %s1348_s22 = smov (!%p241_p9), 16   ;;  %v369_v17 = vlaneseq (!%p241_p9) }
   0xe   : > { %244 = sbr.rel (%p241_p9) target bundleno = 868 (0x364), region = 48  ;;  %354 = vmatprep.mubr.bf16.mxu0 (!%p241_p9), %v1347_v0  ;;  %1278 = vset.pattern.permute.xlu0 (!%p241_p9), %v1347_v0  ;;  %v278_v6 = vld [vmem:[%s1712_s1] sm:$0x3] (!%p241_p9)  ;;  %s1349_s23 = smov (!%p241_p9), 17   ;;  %v292_v16 = vld [vmem:[%s1716_s5 + $0x8] sm:$0xff] (!%p241_p9)  ;;  %vm415_vm3 = vcmask (!%p241_p9), 1041408  }
   0xf   : > { %305 = vperm.xlu0 (!%p241_p9), %1278, %v290_v1   ;;  %454 = vmatprep.mubr.bf16.mxu1 (!%p241_p9), %v1347_v0  ;;  %s1350_s29 = smov (!%p241_p9), 15   ;;  %s1351_s8 = smov (!%p241_p9), 1   ;;  %v376_v18 = vshrl.u32 (!%p241_p9), %v369_v17, 7  ;;  %v1498_v19 = vand.u32 (!%p241_p9), 127, %v369_v17  ;;  %v294_v22 = vld [vmem:[%s1717_s6 + $0x2] sm:$0x3] (!%p241_p9) }
  0x10   : > { %1279 = vset.pattern.permute.xlu1 (!%p241_p9), %v1347_v0  ;;  %s1352_s9 = smov (!%p241_p9), 127   ;;  %s1353_s13 = smov (!%p241_p9), 113   ;;  %v293_v26 = vld [vmem:[%s1717_s6] sm:$0x3] (!%p241_p9)  ;;  %v295_v34 = vld [vmem:[%s1717_s6 + $0x4] sm:$0x3] (!%p241_p9) }
  0x11   : > { %s1354_s14 = smov (!%p241_p9), 112   ;;  %v1500_v20 = vsub.s32 (!%p241_p9), 0, %v376_v18  ;;  %v1502_v21 = vsub.s32 (!%p241_p9), 1, %v376_v18  ;;  %vm393_vm1 = vcmp.lt.s32.totalorder (!%p241_p9), %v1498_v19, 16  ;;  %vm371_vm2 = vcmp.lt.s32.totalorder (!%p241_p9), %v1498_v19, 17  ;;  %s1227_s18 = sshll.u32 (!%p241_p9), %s1420_s28, 8 }
  0x12   : > { %vm517_vm4 = vcmp.lt.s32.totalorder (!%p241_p9), %v1498_v19, 15  ;;  %v296_v46 = vld [vmem:[%s1717_s6 + $0x6] sm:$0x3] (!%p241_p9)  ;;  %v280_v48 = vld [vmem:[%s1713_s2 + $0x2] sm:$0x3] (!%p241_p9)  ;;  %vm411_vm5 = vcmask (!%p241_p9), 31744   ;;  %s1664_s21 = scalar_lea.hbm (!%p241_p9), %s1718_s7, %s1227_s18 }
  0x13   : > { %v400_v23 = vrot.slane (!%p241_p9), %v294_v22, %v1500_v20  ;;  %v404_v24 = vrot.slane (!%p241_p9), %v294_v22, %v1502_v21  ;;  %v378_v31 = vrot.slane (!%p241_p9), %v293_v26, %v1500_v20  ;;  %v382_v32 = vrot.slane (!%p241_p9), %v293_v26, %v1502_v21  ;;  %v297_v59 = vld [vmem:[%s1717_s6 + $0xa] sm:$0x3] (!%p241_p9)  ;;  %v279_v61 = vld [vmem:[%s1713_s2] sm:$0x3] (!%p241_p9) }
  0x14   : > { %v524_v41 = vrot.slane (!%p241_p9), %v295_v34, %v1500_v20  ;;  %v528_v45 = vrot.slane (!%p241_p9), %v295_v34, %v1502_v21  ;;  %vm591_vm6 = vcmp.lt.s32.totalorder (!%p241_p9), %v1498_v19, 1  ;;  %v598_v54 = vrot.slane (!%p241_p9), %v296_v46, %v1500_v20 }
  0x15   : > { %s273_s15 = scalar_select %p272_p10, %s1420_s28, 1  ;;  %v602_v58 = vrot.slane %v296_v46, %v1502_v21  ;;  %vm719_vm7 = vcmp.lt.s32.totalorder %v1498_v19, 127  ;;  %vm793_vm8 = vcmp.lt.s32.totalorder %v1498_v19, 113  ;;  %vm867_vm9 = vcmp.lt.s32.totalorder %v1498_v19, 112  ;;  %v283_v46 = vld [vmem:[%s1713_s2 + $0x8] sm:$0x3] }
  0x16   : > { %vm941_vm10 = vcmp.lt.s32.totalorder %v1498_v19, 111 }
  0x17   : > { %s1224_s16 = sshll.u32 %s273_s15, 4  ;;  %s1355_s15 = smov 111  }
  0x18   : > { %s276_s19 = scalar_lea.vmem %s1711_s0, %s1224_s16 }
  0x19   : > { %v1459_v2 = vld [vmem:[%s276_s19] sm:$0xff]  ;;  %v1461_v3 = vld [vmem:[%s276_s19 + $0x8] sm:$0xff] }
  0x1a   : > { %v1194_v4 = vcombine.high %v1459_v2, %v1461_v3  ;;  %v1193_v5 = vcombine.low %v1459_v2, %v1461_v3 }
  0x1c   : > { %322 = vmatprep.subr.bf16.mxu0 %v1194_v4 }
  0x1d   : > { %323 = vmatpush1.bf16.msra.mxu0 %v1193_v5 }
  0x20   : > { %1195 = vmatmul.mubr.msk.bf16.vlgmr.msra.gmra.mrb[0].mxu0 %vm318_vm0, %v278_v6 }
  0x21   : > { %504 = vmatprep.mubr.bf16.mxu0 %v1347_v0 }
  0x8e   : > { %v1471_v7 = vpop.permute.xlu0 %305 }
  0xf3   : > { %v356_v8 = vpop.f32.mrb[0].mxu0 }
  0xf4   : > { %v357_v9 = vadd.f32 %v356_v8, %v1471_v7  ;;  %v358_v10 = vpop.f32.mrb[1].mxu0 }
  0xf5   : > { %v359_v11 = vadd.f32 %v358_v10, %v1471_v7  ;;  %v360_v12 = vpop.f32.mrb[2].mxu0 }
  0xf6   : > { %v1475_v13 = vmax.f32 %v357_v9, 0.0  ;;  %v361_v14 = vpop.f32.mrb[3].mxu0  ;;  %v726_v9 = vrot.slane %v297_v59, %v1500_v20 }
  0xf7   : > { %v1477_v15 = vmax.f32 %v359_v11, 0.0  ;;  %v298_v14 = vld [vmem:[%s1717_s6 + $0xc] sm:$0x3] }
  0xf8   : > { %389 = vrot.lane.b32.xlu0 %v1475_v13, %s1348_s22  ;;  %v661_v5 = vpack.c.bf16 %v1475_v13, %v1475_v13  ;;  %v800_v26 = vrot.slane %v298_v14, %v1500_v20 }
  0xf9   : > { %391 = vrot.lane.b32.xlu1 %v1477_v15, %s1348_s22  ;;  %v662_v4 = vpack.c.bf16 %v1477_v15, %v1477_v15 }
  0xfc   : > { %367 = vrot.lane.b32.xlu0 %v1477_v15, %s1349_s23 }
  0xfd   : > { %365 = vrot.lane.b32.xlu1 %v1475_v13, %s1349_s23  ;;  %s1356_s23 = smov [#allocation2]  }
 0x100   : > { %515 = vrot.lane.b32.xlu0 %v1477_v15, %s1350_s29 }
 0x101   : > { %513 = vrot.lane.b32.xlu1 %v1475_v13, %s1350_s29  ;;  %s1287_s29 = sshll.u32 %s1356_s23, 4  ;;  %s1288_s29 = int_to_ptr.vmem [resolvable:$false] %s1287_s29 }
 0x104   : > { %589 = vrot.lane.b32.xlu0 %v1477_v15, %s1351_s8 }
 0x105   : > { %587 = vrot.lane.b32.xlu1 %v1475_v13, %s1351_s8  ;;  %s1289_s8 = scalar_lea.vmem %s1288_s29, 512 }
 0x108   : > { %717 = vrot.lane.b32.xlu0 %v1477_v15, %s1352_s9 }
 0x109   : > { %715 = vrot.lane.b32.xlu1 %v1475_v13, %s1352_s9 }
 0x10c   : > { %791 = vrot.lane.b32.xlu0 %v1477_v15, %s1353_s13 }
 0x10d   : > { %789 = vrot.lane.b32.xlu1 %v1475_v13, %s1353_s13 }
 0x110   : > { %865 = vrot.lane.b32.xlu0 %v1477_v15, %s1354_s14 }
 0x111   : > { %863 = vrot.lane.b32.xlu1 %v1475_v13, %s1354_s14  ;;  %s269_s14 = sand.u32 1, %s1337_s25  }
 0x112   : > { %s1670_s22 = scalar_lea.sflag [#allocation3], %s269_s14 }
 0x114   : > { %939 = vrot.lane.b32.xlu0 %v1477_v15, %s1355_s15 }
 0x115   : > { %937 = vrot.lane.b32.xlu1 %v1475_v13, %s1355_s15  ;;  %v730_v13 = vrot.slane %v297_v59, %v1502_v21  ;;  %s1190_s15 = sshll.u32 %s269_s14, 4 }
 0x116   : > { %s271_s16 = scalar_lea.vmem [#allocation2], %s1190_s15 }
 0x117   : > { %s1124_s17 = sshll.u32 %s271_s16, 4  ;;  %s1666_s17 = int_to_ptr.vmem [resolvable:$true] %s1124_s17 }
 0x118   : > { %1024 = vperm.xlu0 %1278, %v292_v16   ;;  %v281_v16 = vld [vmem:[%s1713_s2 + $0x4] sm:$0x3]  ;;  %s1283_s28 = scalar_lea.vmem %s1666_s17, 256  ;;  %p1290_p0 = scmp.lt.s32.totalorder %s1666_s17, %s1288_s29 }
 0x119   : > { %p1284_p11 = scmp.ne.s32.totalorder %s1666_s17, %s1283_s28  ;;  %p1291_p1 = scmp.lt.s32.totalorder %s1289_s8, %s1283_s28 }
 0x11b   : > { %p1285_p12 = pnand %p1284_p11, %p1437_p5  ;;  %p1292_p2 = por %p1291_p1, %p1290_p0 }
 0x11d   : > { %p1286_p13 = pneg %p1285_p12 }
 0x11f   : > { %p1293_p3 = pnand %p1292_p2, %p1286_p13 }
 0x16a   : > { %v390_v25 = vpop.permute.xlu0 %389 }
 0x16b   : > { %v392_v27 = vpop.permute.xlu1 %391 }
 0x16c   : > { %v394_v28 = vsel %vm393_vm1, %v390_v25, %v392_v27  ;;  %v395_v29 = vsel %vm393_vm1, %v392_v27, %v390_v25 }
 0x16d   : > { %v407_v30 = vmul.f32 %v400_v23, %v395_v29  ;;  %v408_v33 = vmul.f32 %v404_v24, %v394_v28  ;;  %v667_v23 = vsel %vm415_vm3, %v661_v5, 0 }
 0x16e   : > { %v368_v35 = vpop.permute.xlu0 %367 }
 0x16f   : > { %v366_v36 = vpop.permute.xlu1 %365  ;;  %v410_v37 = vpack.c.bf16 %v408_v33, %v408_v33  ;;  %v409_v38 = vpack.c.bf16 %v407_v30, %v407_v30  ;;  %v804_v30 = vrot.slane %v298_v14, %v1502_v21  ;;  %v282_v33 = vld [vmem:[%s1713_s2 + $0x6] sm:$0x3] }
 0x170   : > { %v372_v39 = vsel %vm371_vm2, %v366_v36, %v368_v35  ;;  %v373_v40 = vsel %vm371_vm2, %v368_v35, %v366_v36 }
 0x171   : > { %v385_v42 = vmul.f32 %v378_v31, %v373_v40  ;;  %v386_v43 = vmul.f32 %v382_v32, %v372_v39  ;;  %1196 = vmatprep.subr.msk.bf16.mxu1 %vm415_vm3, %v410_v37  ;;  %v417_v44 = vsel %vm415_vm3, %v409_v38, 0  ;;  %v299_v31 = vld [vmem:[%s1717_s6 + $0xe] sm:$0x3] }
 0x172   : > { %423 = vmatpush1.bf16.msra.mxu1 %v417_v44  ;;  %v516_v47 = vpop.permute.xlu0 %515  ;;  %v874_v39 = vrot.slane %v299_v31, %v1500_v20  ;;  %v300_v44 = vld [vmem:[%s1717_s6 + $0x10] sm:$0x3] }
 0x173   : > { %v387_v49 = vpack.c.bf16 %v385_v42, %v385_v42  ;;  %v388_v50 = vpack.c.bf16 %v386_v43, %v386_v43  ;;  %v514_v51 = vpop.permute.xlu1 %513  ;;  %v878_v43 = vrot.slane %v299_v31, %v1502_v21 }
 0x174   : > { %v518_v52 = vsel %vm517_vm4, %v514_v51, %v516_v47  ;;  %v519_v53 = vsel %vm517_vm4, %v516_v47, %v514_v51 }
 0x175   : > { %v531_v55 = vmul.f32 %v524_v41, %v519_v53  ;;  %v532_v56 = vmul.f32 %v528_v45, %v518_v52  ;;  %1197 = vmatmul.mubr.msk.bf16.vlgmr.msra.gmra.mrb[0].mxu1 %vm411_vm5, %v280_v48  ;;  %1198 = vmatprep.subr.msk.bf16.mxu0 %vm415_vm3, %v388_v50  ;;  %v467_v57 = vsel %vm415_vm3, %v387_v49, 0  ;;  %v948_v52 = vrot.slane %v300_v44, %v1500_v20 }
 0x176   : > { %473 = vmatpush1.bf16.msra.mxu0 %v467_v57  ;;  %v590_v60 = vpop.permute.xlu0 %589  ;;  %576 = vmatprep.mubr.bf16.mxu1 %v1347_v0 }
 0x177   : > { %v533_v62 = vpack.c.bf16 %v531_v55, %v531_v55  ;;  %v534_v63 = vpack.c.bf16 %v532_v56, %v532_v56  ;;  %v588_v1 = vpop.permute.xlu1 %587  ;;  %v952_v56 = vrot.slane %v300_v44, %v1502_v21 }
 0x178   : > { %v592_v6 = vsel %vm591_vm6, %v588_v1, %v590_v60  ;;  %v593_v8 = vsel %vm591_vm6, %v590_v60, %v588_v1 }
 0x179   : > { %v605_v10 = vmul.f32 %v598_v54, %v593_v8  ;;  %v606_v11 = vmul.f32 %v602_v58, %v592_v6  ;;  %1199 = vmatmul.mubr.msk.bf16.vlgmr.msra.gmra.mrb[4].mxu0 %vm411_vm5, %v279_v61  ;;  %1200 = vmatprep.subr.msk.bf16.mxu1 %vm415_vm3, %v534_v63  ;;  %v539_v12 = vsel %vm415_vm3, %v533_v62, 0  ;;  %v284_v58 = vld [vmem:[%s1713_s2 + $0xa] sm:$0x3]  ;;  %v286_v8 = vld [vmem:[%s1713_s2 + $0xe] sm:$0x3] }
 0x17a   : > { %545 = vmatpush1.bf16.msra.mxu1 %v539_v12  ;;  %v718_v15 = vpop.permute.xlu0 %717  ;;  %650 = vmatprep.mubr.bf16.mxu0 %v1347_v0 }
 0x17b   : > { %v607_v17 = vpack.c.bf16 %v605_v10, %v605_v10  ;;  %v608_v18 = vpack.c.bf16 %v606_v11, %v606_v11  ;;  %v716_v22 = vpop.permute.xlu1 %715  ;;  %1204 = vmatprep.subr.msk.bf16.mxu1 %vm415_vm3, %v662_v4  ;;  %v285_v4 = vld [vmem:[%s1713_s2 + $0xc] sm:$0x3]  ;;  %v291_v10 = vld [vmem:[%s1716_s5] sm:$0xff] }
 0x17c   : > { %v720_v24 = vsel %vm719_vm7, %v716_v22, %v718_v15  ;;  %v721_v25 = vsel %vm719_vm7, %v718_v15, %v716_v22  ;;  %1019 = vperm.xlu1 %1279, %v291_v10  }
 0x17d   : > { %v733_v27 = vmul.f32 %v726_v9, %v720_v24  ;;  %v734_v28 = vmul.f32 %v730_v13, %v721_v25  ;;  %1201 = vmatmul.mubr.msk.bf16.vlgmr.msra.gmra.mrb[4].mxu1 %vm411_vm5, %v281_v16  ;;  %1202 = vmatprep.subr.msk.bf16.mxu0 %vm415_vm3, %v608_v18  ;;  %v613_v29 = vsel %vm415_vm3, %v607_v17, 0  ;;  %v287_v9 = vld [vmem:[%s1713_s2 + $0x10] sm:$0x3] }
 0x17e   : > { %619 = vmatpush1.bf16.msra.mxu0 %v613_v29  ;;  %v792_v32 = vpop.permute.xlu0 %791  ;;  %673 = vmatpush1.bf16.msra.mxu1 %v667_v23 }
 0x17f   : > { %v735_v34 = vpack.c.bf16 %v733_v27, %v733_v27  ;;  %v736_v35 = vpack.c.bf16 %v734_v28, %v734_v28  ;;  %v790_v36 = vpop.permute.xlu1 %789  ;;  %704 = vmatprep.mubr.bf16.mxu1 %v1347_v0 }
 0x180   : > { %v794_v37 = vsel %vm793_vm8, %v790_v36, %v792_v32  ;;  %v795_v38 = vsel %vm793_vm8, %v792_v32, %v790_v36 }
 0x181   : > { %v807_v40 = vmul.f32 %v800_v26, %v794_v37  ;;  %v808_v41 = vmul.f32 %v804_v30, %v795_v38  ;;  %1203 = vmatmul.mubr.msk.bf16.vlgmr.msra.gmra.mrb[8].mxu0 %vm411_vm5, %v282_v33  ;;  %1206 = vmatprep.subr.msk.bf16.mxu0 %vm415_vm3, %v736_v35  ;;  %v741_v42 = vsel %vm415_vm3, %v735_v34, 0 }
 0x182   : > { %747 = vmatpush1.bf16.msra.mxu0 %v741_v42  ;;  %v866_v45 = vpop.permute.xlu0 %865  ;;  %778 = vmatprep.mubr.bf16.mxu0 %v1347_v0 }
 0x183   : > { %v809_v47 = vpack.c.bf16 %v807_v40, %v807_v40  ;;  %v810_v48 = vpack.c.bf16 %v808_v41, %v808_v41  ;;  %v864_v49 = vpop.permute.xlu1 %863 }
 0x184   : > { %v868_v50 = vsel %vm867_vm9, %v864_v49, %v866_v45  ;;  %v869_v51 = vsel %vm867_vm9, %v866_v45, %v864_v49 }
 0x185   : > { %v881_v53 = vmul.f32 %v874_v39, %v868_v50  ;;  %v882_v54 = vmul.f32 %v878_v43, %v869_v51  ;;  %1205 = vmatmul.mubr.msk.bf16.vlgmr.msra.gmra.mrb[8].mxu1 %vm411_vm5, %v283_v46  ;;  %1208 = vmatprep.subr.msk.bf16.mxu1 %vm415_vm3, %v810_v48  ;;  %v815_v55 = vsel %vm415_vm3, %v809_v47, 0 }
 0x186   : > { %v940_v57 = vpop.permute.xlu0 %939  ;;  %821 = vmatpush1.bf16.msra.mxu1 %v815_v55  ;;  %852 = vmatprep.mubr.bf16.mxu1 %v1347_v0 }
 0x187   : > { %v883_v59 = vpack.c.bf16 %v881_v53, %v881_v53  ;;  %v884_v20 = vpack.c.bf16 %v882_v54, %v882_v54  ;;  %v938_v60 = vpop.permute.xlu1 %937 }
 0x188   : > { %v942_v61 = vsel %vm941_vm10, %v938_v60, %v940_v57  ;;  %v943_v62 = vsel %vm941_vm10, %v940_v57, %v938_v60 }
 0x189   : > { %v955_v63 = vmul.f32 %v948_v52, %v942_v61  ;;  %v956_v1 = vmul.f32 %v952_v56, %v943_v62  ;;  %1207 = vmatmul.mubr.msk.bf16.vlgmr.msra.gmra.mrb[12].mxu0 %vm411_vm5, %v284_v58  ;;  %1210 = vmatprep.subr.msk.bf16.mxu0 %vm415_vm3, %v884_v20  ;;  %v889_v21 = vsel %vm415_vm3, %v883_v59, 0 }
 0x18a   : > { %895 = vmatpush1.bf16.msra.mxu0 %v889_v21  ;;  %926 = vmatprep.mubr.bf16.mxu0 %v1347_v0 }
 0x18b   : > { %v957_v5 = vpack.c.bf16 %v955_v63, %v955_v63  ;;  %v958_v6 = vpack.c.bf16 %v956_v1, %v956_v1 }
 0x18d   : > { %1209 = vmatmul.mubr.msk.bf16.vlgmr.msra.gmra.mrb[12].mxu1 %vm411_vm5, %v285_v4  ;;  %1212 = vmatprep.subr.msk.bf16.mxu1 %vm415_vm3, %v958_v6  ;;  %v963_v19 = vsel %vm415_vm3, %v957_v5, 0 }
 0x18e   : > { %969 = vmatpush1.bf16.msra.mxu1 %v963_v19  ;;  %1000 = vmatprep.mubr.bf16.mxu1 %v1347_v0 }
 0x191   : > { %1211 = vmatmul.mubr.msk.bf16.vlgmr.msra.gmra.mrb[16].mxu0 %vm411_vm5, %v286_v8 }
 0x192   : > { %1073 = vmatprep.mubr.bf16.mxu0 %v1347_v0 }
 0x195   : > { %1213 = vmatmul.mubr.msk.bf16.vlgmr.msra.gmra.mrb[16].mxu1 %vm411_vm5, %v287_v9  ;;  %v1282_v9 = vld [vmem:[%s1714_s3] sm:$0xff]  }
 0x1fb   : > { %v1020_v10 = vpop.permute.xlu1 %1019 }
 0x248   : > { %v456_v11 = vpop.f32.mrb[0].mxu1 }
 0x249   : > { %v458_v12 = vpop.f32.mrb[1].mxu1 }
 0x24a   : > { %v460_v13 = vpop.f32.mrb[2].mxu1 }
 0x24b   : > { %v461_v14 = vpop.f32.mrb[3].mxu1 }
 0x24c   : > { %v506_v15 = vpop.f32.mrb[4].mxu0  ;;  %v1086_v14 = vunpack.c.l.bf16 %v1461_v3 }
 0x24d   : > { %v507_v16 = vadd.f32 %v506_v15, %v456_v11  ;;  %v508_v17 = vpop.f32.mrb[5].mxu0  ;;  %v1084_v11 = vunpack.c.l.bf16 %v1459_v2 }
 0x24e   : > { %v509_v18 = vadd.f32 %v508_v17, %v458_v12  ;;  %v510_v22 = vpop.f32.mrb[6].mxu0  ;;  %v1085_v12 = vunpack.c.h.bf16 %v1459_v2 }
 0x24f   : > { %v511_v23 = vpop.f32.mrb[7].mxu0 }
 0x250   : > { %v578_v24 = vpop.f32.mrb[4].mxu1 }
 0x251   : > { %v585_v25 = vadd.f32 %v578_v24, %v507_v16  ;;  %v580_v0 = vpop.f32.mrb[5].mxu1  ;;  %v1025_v16 = vpop.permute.xlu0 %1024 }
 0x252   : > { %v586_v26 = vadd.f32 %v580_v0, %v509_v18  ;;  %v582_v27 = vpop.f32.mrb[6].mxu1  ;;  %v1087_v18 = vunpack.c.h.bf16 %v1461_v3 }
 0x253   : > { %v583_v28 = vpop.f32.mrb[7].mxu1 }
 0x254   : > { %v652_v29 = vpop.f32.mrb[8].mxu0 }
 0x255   : > { %v659_v30 = vadd.f32 %v652_v29, %v585_v25  ;;  %v654_v31 = vpop.f32.mrb[9].mxu0 }
 0x256   : > { %v660_v32 = vadd.f32 %v654_v31, %v586_v26  ;;  %v656_v33 = vpop.f32.mrb[10].mxu0 }
 0x257   : > { %v657_v34 = vpop.f32.mrb[11].mxu0 }
 0x258   : > { %v706_v35 = vpop.f32.mrb[8].mxu1 }
 0x259   : > { %v713_v36 = vadd.f32 %v706_v35, %v659_v30  ;;  %v708_v37 = vpop.f32.mrb[9].mxu1 }
 0x25a   : > { %v714_v38 = vadd.f32 %v708_v37, %v660_v32  ;;  %v710_v39 = vpop.f32.mrb[10].mxu1 }
 0x25b   : > { %v711_v40 = vpop.f32.mrb[11].mxu1 }
 0x25c   : > { %v780_v41 = vpop.f32.mrb[12].mxu0 }
 0x25d   : > { %v787_v42 = vadd.f32 %v780_v41, %v713_v36  ;;  %v782_v43 = vpop.f32.mrb[13].mxu0 }
 0x25e   : > { %v788_v44 = vadd.f32 %v782_v43, %v714_v38  ;;  %v784_v45 = vpop.f32.mrb[14].mxu0 }
 0x25f   : > { %v785_v46 = vpop.f32.mrb[15].mxu0 }
 0x260   : > { %v854_v47 = vpop.f32.mrb[12].mxu1 }
 0x261   : > { %v861_v48 = vadd.f32 %v854_v47, %v787_v42  ;;  %v856_v49 = vpop.f32.mrb[13].mxu1 }
 0x262   : > { %v862_v50 = vadd.f32 %v856_v49, %v788_v44  ;;  %v858_v51 = vpop.f32.mrb[14].mxu1 }
 0x263   : > { %v859_v52 = vpop.f32.mrb[15].mxu1 }
 0x264   : > { %v928_v53 = vpop.f32.mrb[16].mxu0 }
 0x265   : > { %v935_v54 = vadd.f32 %v928_v53, %v861_v48  ;;  %v930_v55 = vpop.f32.mrb[17].mxu0 }
 0x266   : > { %v936_v56 = vadd.f32 %v930_v55, %v862_v50  ;;  %v932_v57 = vpop.f32.mrb[18].mxu0 }
 0x267   : > { %v933_v58 = vpop.f32.mrb[19].mxu0 }
 0x268   : > { %v1002_v59 = vpop.f32.mrb[16].mxu1 }
 0x269   : > { %v1009_v20 = vadd.f32 %v1002_v59, %v935_v54  ;;  %v1004_v60 = vpop.f32.mrb[17].mxu1 }
 0x26a   : > { %v1010_v61 = vadd.f32 %v1004_v60, %v936_v56  ;;  %v1006_v62 = vpop.f32.mrb[18].mxu1 }
 0x26b   : > { %v1011_v63 = vadd.f32 %v1009_v20, %v1471_v7  ;;  %v1007_v1 = vpop.f32.mrb[19].mxu1 }
 0x26c   : > { %v1012_v21 = vadd.f32 %v1010_v61, %v1471_v7 }
 0x26d   : > { %v1013_v4 = vmax.f32 %v1011_v63, 0.0 }
 0x26e   : > { %v1014_v5 = vmax.f32 %v1012_v21, 0.0 }
 0x26f   : > { %v1015_v6 = vpack.c.bf16 %v1013_v4, %v1013_v4 }
 0x270   : > { %v1016_v19 = vpack.c.bf16 %v1014_v5, %v1014_v5 }
 0x271   : > { %v1036_v8 = vsel %vm415_vm3, %v1015_v6, 0 }
 0x272   : > { %1215 = vmatprep.subr.msk.bf16.mxu0 %vm415_vm3, %v1016_v19 }
 0x273   : > { %1042 = vmatpush1.bf16.msra.mxu0 %v1036_v8 }
 0x276   : > { %1216 = vmatmul.mubr.msk.bf16.vlgmr.msra.gmra.mrb[20].mxu0 %vm411_vm5, %v1282_v9 }
 0x349   : > { %v1075_v7 = vpop.f32.mrb[20].mxu0 }
 0x34a   : > { %v1077_v13 = vpop.f32.mrb[21].mxu0  ;;  %v1076_v15 = vadd.f32 %v1075_v7, %v1020_v10 }
 0x34b   : > { %v1079_v17 = vpop.f32.mrb[22].mxu0  ;;  %v1078_v22 = vadd.f32 %v1077_v13, %v1020_v10 }
 0x34c   : > { %v1080_v23 = vadd.f32 %v1079_v17, %v1025_v16  ;;  %v1081_v24 = vpop.f32.mrb[23].mxu0  ;;  %v1088_v25 = vadd.f32 %v1084_v11, %v1076_v15 }
 0x34d   : > { %v1082_v0 = vadd.f32 %v1081_v24, %v1025_v16  ;;  %v1089_v26 = vadd.f32 %v1085_v12, %v1078_v22 }
 0x34e   : > { %v1090_v27 = vadd.f32 %v1086_v14, %v1080_v23  ;;  %v1092_v28 = vmax.f32 %v1088_v25, 0.0 }
 0x34f   : > { %v1091_v29 = vadd.f32 %v1087_v18, %v1082_v0  ;;  %v1093_v2 = vmax.f32 %v1089_v26, 0.0 }
 0x350   : > { %v1094_v30 = vmax.f32 %v1090_v27, 0.0 }
 0x351   : > { %v1095_v31 = vmax.f32 %v1091_v29, 0.0  ;;  %v1225_v32 = vpack.c.bf16 %v1093_v2, %v1092_v28 }
 0x353   : > { %v1226_v3 = vpack.c.bf16 %v1095_v31, %v1094_v30  ;;  %1108 = vst [vmem:[%s271_s16] sm:$0xff] %v1225_v32 }
 0x355   : > { %1109 = vst [vmem:[%s271_s16 + $0x8] sm:$0xff] %v1226_v3 }
 0x356   : > { %1296 = shalt.err (!%p1293_p3)
}
 0x357   : > { %s1297_s9 = scalar_lea.hbm %s1664_s21, 256  ;;  %s1301_s15 = scalar_lea.hbm %s1718_s7, 512 }
 0x358   : > { %p1298_p4 = scmp.ne.s32.totalorder %s1664_s21, %s1297_s9  ;;  %p1302_p9 = scmp.lt.u32.totalorder %s1664_s21, %s1718_s7 }
 0x359   : > { %p1303_p10 = scmp.lt.u32.totalorder %s1301_s15, %s1297_s9  ;;  %p1305_p12 = scmp.lt.u32.totalorder %s1297_s9, %s1664_s21 }
 0x35a   : > { %p1299_p7 = pnand %p1298_p4, %p1437_p5 }
 0x35b   : > { %p1304_p11 = por %p1303_p10, %p1302_p9 }
 0x35c   : > { %p1300_p8 = pneg %p1299_p7 }
 0x35d   : > { %p1306_p13 = por %p1305_p12, %p1304_p11 }
 0x35f   : > { %p1307_p0 = pnand %p1306_p13, %p1300_p8 }
 0x361   : > { %1310 = shalt.err (!%p1307_p0)
}
 0x362   : > { %s1357_s19 = smov 128   ;;  %s1358_s20 = smov 8  }
 0x363   : > { %1228 = dma.vmem_to_hbm [thread:$0]  (%p1437_p5), %s1666_s17, 256, %s1664_s21, %s1670_s22, %s1357_s19, %s1357_s19, %s1358_s20  }
 0x364 PF: > { %p1234_p1 = scmp.ge.s32.totalorder %s1345_s27, 2  ;;  %s1139_s28 = sand.u32 1, %s1333_s24  }
 0x365   : > { %s1140_s23 = scalar_lea.sflag [#allocation3], %s1139_s28 }
 0x366   : > { %p1231_p2 = pnand %p1234_p1, %p1441_p6 }
 0x368   : > { %1328 = dma.done.wait (!%p1231_p2), %s1140_s23, 256  }
 0x369   : > { %1330 = vsyncadd (!%p1231_p2), %s1140_s23, 4294967040  ;;  %p17_p3 = scmp.ge.s32.totalorder %s1424_s30, 4   ;;  %s1721_s24 = smov %s1337_s25 }
 0x36a   : > { %s1722_s25 = smov %s1341_s26  ;;  %s1723_s26 = smov %s1435_s10 }
 0x36b   : > { %s1724_s27 = smov %s1424_s30  ;;  %19 = sbr.rel (!%p17_p3) target bundleno = 3 (0x3), region = 83 }
 0x372   :  { %1145 = vsyncpa [#allocation3], 1 }
 0x373   :  { %1147 = vsyncpa [#allocation3 + $0x1], 1 }

</bundles_post_ra>
